<compile_context>
chip_gen: v7x
topology: tpu7x:2x2x1
jax: 0.10.0
libtpu: 0.0.40
codegen_flags: <defaults>
</compile_context>

<pallas_src>
import functools

import jax
import jax.numpy as jnp
from jax.experimental import pallas as pl
from jax.experimental.pallas import tpu as pltpu


def _zero_tofs_kernel(params_ref, x_ref, o_ref, *, lane_tile, tof_count):
    """Zero the wrap-around TOF-column block [start, start+count) mod tof_count.

    params_ref: SMEM int32[2] = [start, count] (scalar-prefetched).
    x_ref/o_ref: (rows, lane_tile) VMEM tiles of the current lane block.
    """
    start = params_ref[0]
    count = params_ref[1]
    j = pl.program_id(0)
    # Absolute column index of every lane in this tile (2-D iota for TPU).
    col = jax.lax.broadcasted_iota(jnp.int32, (1, lane_tile), 1) + j * lane_tile
    # Column is disabled iff (col - start) mod T < count  (handles wrap-around).
    disabled = jnp.mod(col - start, tof_count) < count          # (1, lane_tile)
    x = x_ref[...]
    o_ref[...] = jnp.where(disabled, jnp.zeros_like(x), x)


def _pick_lane_tile(tof_count):
    """Largest lane-dense tile (multiple of 128, >=512 preferred) dividing T."""
    if tof_count % 128 != 0:
        return tof_count  # full-array block (allowed: equals the full dim)
    for lt in (4096, 2048, 1024, 512, 256, 128):
        if tof_count % lt == 0:
            return lt
    return tof_count


def zero_tof_range(img, start, count, lane_tile=None):
    """out = img with columns [start, start+count) (mod T) set to 0. img: (rows, T)."""
    rows, tof_count = img.shape
    lt = lane_tile if lane_tile is not None else _pick_lane_tile(tof_count)
    assert tof_count % lt == 0
    grid = (tof_count // lt,)

    params = jnp.stack([jnp.asarray(start, jnp.int32),
                        jnp.asarray(count, jnp.int32)])

    itemsize = jnp.dtype(img.dtype).itemsize
    nbytes = rows * tof_count * itemsize

    tile_spec = pl.BlockSpec((rows, lt), lambda j, p: (0, j))

    return pl.pallas_call(
        functools.partial(_zero_tofs_kernel, lane_tile=lt, tof_count=tof_count),
        out_shape=jax.ShapeDtypeStruct(img.shape, img.dtype),
        grid_spec=pltpu.PrefetchScalarGridSpec(
            num_scalar_prefetch=1,      # params -> SMEM, passed to index_maps
            grid=grid,
            in_specs=[tile_spec],
            out_specs=tile_spec,
        ),
        compiler_params=pltpu.CompilerParams(
            dimension_semantics=("parallel",)),
        cost_estimate=pl.CostEstimate(
            flops=2 * rows * tof_count,
            transcendentals=0,
            bytes_accessed=2 * nbytes + 8),
    )(params, img)


def disable_neighbor_tofs(img, min_disabled_tofs_count, max_disabled_tofs_count,
                          key, lane_tile=None):
    """JAX/Pallas equivalent of DisableNeighborTOFs.forward (img: (rows, T))."""
    rows, tof_count = img.shape
    k_count, k_start = jax.random.split(key)
    count = jax.random.randint(k_count, (), min_disabled_tofs_count,
                               max_disabled_tofs_count + 1, dtype=jnp.int32)
    # The torch loop always disables at least 1 and at most T distinct TOFs.
    count = jnp.clip(count, 1, tof_count)
    start = jax.random.randint(k_start, (), 0, tof_count, dtype=jnp.int32)
    out = zero_tof_range(img, start, count, lane_tile=lane_tile)
    return out, start, count


def _reference(img, start, count):
    rows, tof_count = img.shape
    cols = jnp.arange(tof_count)
    disabled = jnp.mod(cols - start, tof_count) < count
    return jnp.where(disabled[None, :], jnp.zeros_like(img), img)


if __name__ == "__main__":
    key = jax.random.PRNGKey(0)
    k_img, k_tofs, k_img2, k_tofs2 = jax.random.split(key, 4)

    # Case 1: small sensor-like image, random disabled block (T not /128 -> full block).
    rows, tofs = 16, 64
    min_c, max_c = 2, 5
    img = jax.random.normal(k_img, (rows, tofs), dtype=jnp.float32)
    out, start, count = disable_neighbor_tofs(img, min_c, max_c, k_tofs)
    out = jax.block_until_ready(out)
    s, c = int(start), int(count)
    ref = _reference(img, s, c)
    assert out.shape == img.shape and out.dtype == img.dtype
    assert min_c <= c <= max_c, "disabled count outside [min, max]"
    assert jnp.array_equal(out, ref), "mismatch (random block)"
    n_zero_cols = int(jnp.sum(jnp.all(out == 0.0, axis=0)))
    assert n_zero_cols >= c, "not enough zeroed TOF columns"

    # Case 2: multi-tile grid (T=1024, lane_tile=512 -> 2 grid steps), random block.
    img2 = jax.random.normal(k_img2, (8, 1024), dtype=jnp.float32)
    out2, start2, count2 = disable_neighbor_tofs(img2, 3, 9, k_tofs2, lane_tile=512)
    out2 = jax.block_until_ready(out2)
    ref2 = _reference(img2, int(start2), int(count2))
    assert jnp.array_equal(out2, ref2), "mismatch (multi-tile grid)"

    # Case 3: explicit wrap-around block crossing the end of the TOF axis.
    out3 = jax.block_until_ready(zero_tof_range(img2, 1020, 7, lane_tile=512))
    ref3 = _reference(img2, 1020, 7)
    assert jnp.array_equal(out3, ref3), "mismatch (wrap-around block)"
    # Untouched columns must equal the original (clone semantics).
    keep = jnp.mod(jnp.arange(1024) - 1020, 1024) >= 7
    assert jnp.array_equal(out3[:, keep], img2[:, keep]), "clone semantics violated"

    # TODO(synk): the torch-side data-dependent `assert len(disabled_tofs) ...`
    # is checked here on host; it has no in-kernel equivalent.
    print("KERNEL_OK")
</pallas_src>

<mosaic_0001>
module attributes {stable_mosaic.version = 11 : i64} {
  func.func @_zero_tofs_kernel(%arg0: i32, %arg1: memref<2xi32, #tpu.memory_space<smem>>, %arg2: memref<16x64xf32, #tpu.memory_space<vmem>>, %arg3: memref<16x64xf32, #tpu.memory_space<vmem>>) attributes {dimension_semantics = [#tpu.dimension_semantics<parallel>], iteration_bounds = array<i64: 1>, scalar_prefetch = 1 : i64, scratch_operands = 0 : i64, tpu.core_type = #tpu.core_type<tc>, window_params = [{transform_indices = @transform_0, window_bounds = array<i64: 16, 64>}, {transform_indices = @transform_1, window_bounds = array<i64: 16, 64>}]} {
    %c0 = arith.constant 0 : index
    %0 = memref.load %arg1[%c0] : memref<2xi32, #tpu.memory_space<smem>>
    %c1 = arith.constant 1 : index
    %1 = memref.load %arg1[%c1] : memref<2xi32, #tpu.memory_space<smem>>
    %2 = tpu.iota {dimensions = array<i32: 1>} : vector<1x64xi32>
    %c64_i32 = arith.constant 64 : i32
    %3 = arith.muli %arg0, %c64_i32 : i32
    %4 = vector.broadcast %3 : i32 to vector<1x64xi32>
    %5 = arith.addi %2, %4 : vector<1x64xi32>
    %6 = vector.broadcast %0 : i32 to vector<1x64xi32>
    %7 = arith.subi %5, %6 : vector<1x64xi32>
    %c64_i32_0 = arith.constant 64 : i32
    %c0_i32 = arith.constant 0 : i32
    %8 = arith.cmpi eq, %c64_i32_0, %c0_i32 : i32
    %c1_i32 = arith.constant 1 : i32
    %9 = arith.select %8, %c1_i32, %c64_i32_0 : i32
    %10 = vector.broadcast %9 : i32 to vector<1x64xi32>
    %11 = arith.remsi %7, %10 : vector<1x64xi32>
    %c0_i32_1 = arith.constant 0 : i32
    %12 = vector.broadcast %c0_i32_1 : i32 to vector<1x64xi32>
    %13 = arith.cmpi ne, %11, %12 : vector<1x64xi32>
    %c0_i32_2 = arith.constant 0 : i32
    %14 = vector.broadcast %c0_i32_2 : i32 to vector<1x64xi32>
    %15 = arith.cmpi slt, %11, %14 : vector<1x64xi32>
    %c0_i32_3 = arith.constant 0 : i32
    %16 = arith.cmpi slt, %9, %c0_i32_3 : i32
    %17 = vector.broadcast %16 : i1 to vector<1x64xi1>
    %18 = vector.broadcast %17 : vector<1x64xi1> to vector<1x64xi1>
    %19 = arith.xori %15, %18 : vector<1x64xi1>
    %20 = arith.andi %19, %13 : vector<1x64xi1>
    %21 = vector.broadcast %9 : i32 to vector<1x64xi32>
    %22 = arith.addi %11, %21 : vector<1x64xi32>
    %23 = arith.select %20, %22, %11 : vector<1x64xi1>, vector<1x64xi32>
    %24 = vector.broadcast %1 : i32 to vector<1x64xi32>
    %25 = arith.cmpi slt, %23, %24 : vector<1x64xi32>
    %c0_4 = arith.constant 0 : index
    %c0_5 = arith.constant 0 : index
    %26 = vector.load %arg2[%c0_4, %c0_5] : memref<16x64xf32, #tpu.memory_space<vmem>>, vector<16x64xf32>
    %cst = arith.constant 0.000000e+00 : f32
    %27 = vector.broadcast %cst : f32 to vector<16x64xf32>
    %28 = vector.shape_cast %25 : vector<1x64xi1> to vector<1x64xi1>
    %29 = vector.broadcast %28 : vector<1x64xi1> to vector<16x64xi1>
    %30 = arith.select %29, %27, %26 : vector<16x64xi1>, vector<16x64xf32>
    %c0_6 = arith.constant 0 : index
    %c0_7 = arith.constant 0 : index
    %31 = vector.load %arg3[%c0_6, %c0_7] : memref<16x64xf32, #tpu.memory_space<vmem>>, vector<16x64xf32>
    tpu.vector_store %arg3[%c0_6, %c0_7], %30 {strides = array<i32>} : memref<16x64xf32, #tpu.memory_space<vmem>>, vector<16x64xf32>,
    return
  }
  func.func @transform_0(%arg0: i32, %arg1: memref<2xi32, #tpu.memory_space<smem>>) -> (i32, i32) {
    %c0_i32 = arith.constant 0 : i32
    %c0_i32_0 = arith.constant 0 : i32
    return %c0_i32, %arg0 : i32, i32
  }
  func.func @transform_1(%arg0: i32, %arg1: memref<2xi32, #tpu.memory_space<smem>>) -> (i32, i32) {
    %c0_i32 = arith.constant 0 : i32
    %c0_i32_0 = arith.constant 0 : i32
    return %c0_i32, %arg0 : i32, i32
  }
}

</mosaic_0001>

<bundles_post_ra>
// kernel: tpu_custom_call.1
= control target key start
LH: loop header
LB: loop body
LE: loop exit
PB: predicated region body
PF: predicated region fallthrough
CT: control target
= control target key end

     0   :  { %s206_s0 = inlined_call_operand.hbm [shape: s32[2], index: 0, kind: input, shape index: {}]   ;;  %s207_s1 = inlined_call_operand.hbm [shape: f32[16,64], index: 1, kind: input, shape index: {}]   ;;  %s208_s2 = inlined_call_operand.hbm [shape: f32[16,64], index: 2, kind: output, shape index: {}]  }
   0x1   :  { %s84_s11 = scalar_lea.hbm %s206_s0, 16 }
   0x2   :  { %p85_p0 = scmp.ne.s32.totalorder %s206_s0, %s84_s11  ;;  %p88_p1 = scmp.lt.u32.totalorder %s84_s11, %s206_s0 }
   0x4   :  { %p90_p2 = pnand %p88_p1, %p85_p0 }
   0x6   :  { %93 = shalt.err (!%p90_p2)  }
   0x7   :  { %s144_s16 = smov [#allocation3]  }
   0x8   :  { %8 = dma.hbm_to_smem %s206_s0, 16, %s144_s16, [#allocation2] }
   0x9   :  { %138 = dma.done.wait [#allocation2], 16 }
   0xa   :  { %139 = vsyncadd [#allocation2], 4294967280 }
   0xb   :  { %10 = sfence }
   0xc   :  { %11 = vsyncpa [#allocation5], 0 }
   0xd   :  { %12 = vsyncpa [#allocation6], 0  ;;  %s145_s19 = smov [#allocation4]   ;;  %s94_s23 = scalar_lea.hbm %s207_s1, 256 }
   0xe   :  { %s18_s20 = sshll.u32 %s145_s19, 4  ;;  %p95_p3 = scmp.ne.s32.totalorder %s207_s1, %s94_s23  ;;  %s19_s20 = int_to_ptr.vmem [resolvable:$true] %s18_s20 }
   0xf   :  { %p98_p4 = scmp.lt.u32.totalorder %s94_s23, %s207_s1 }
  0x11   :  { %p100_p5 = pnand %p98_p4, %p95_p3 }
  0x13   :  { %103 = shalt.err (!%p100_p5)
}
  0x14   :  { %s104_s0 = scalar_lea.vmem %s19_s20, 256  ;;  %p109_p7 = scmp.lt.s32.totalorder %s19_s20, %s19_s20 }
  0x15   :  { %p105_p6 = scmp.ne.s32.totalorder %s19_s20, %s104_s0  ;;  %p110_p8 = scmp.lt.s32.totalorder %s104_s0, %s104_s0 }
  0x17   :  { %p111_p9 = por %p110_p8, %p109_p7 }
  0x19   :  { %p112_p10 = pnand %p111_p9, %p105_p6 }
  0x1b   :  { %115 = shalt.err (!%p112_p10)
}
  0x1c   :  { %s146_s28 = smov 128   ;;  %s147_s29 = smov 8  }
  0x1d   :  { %24 = dma.hbm_to_vmem [thread:$0]  %s207_s1, 256, %s19_s20, [#allocation5], %s146_s28, %s146_s28, %s147_s29  }
  0x1e   :  { %140 = dma.done.wait [#allocation5], 256  }
  0x1f   :  { %141 = vsyncadd [#allocation5], 4294967040  ;;  %v30_v0 = vlaneseq  ;;  %s28_s4 = sld [smem:[#allocation3]]  ;;  %s77_s5 = sld [smem:[#allocation3 + $0x1]]  ;;  %v51_v11 = vld [vmem:[#allocation4] sm:$0xff]  ;;  %v52_v12 = vld [vmem:[#allocation4 + $0x8] sm:$0xff] }
  0x20   :  { %s148_s6 = smov [#allocation7]   ;;  %vm57_vm4 = vcmask 523264  }
  0x21   :  { %v31_v1 = vand.u32 127, %v30_v0  ;;  %s65_s1 = sshll.u32 %s148_s6, 4  ;;  %s66_s1 = int_to_ptr.vmem [resolvable:$true] %s65_s1 }
  0x22   :  { %s116_s7 = scalar_lea.vmem %s66_s1, 256  ;;  %p121_p12 = scmp.lt.s32.totalorder %s66_s1, %s66_s1 }
  0x23   :  { %p117_p11 = scmp.ne.s32.totalorder %s66_s1, %s116_s7  ;;  %p122_p13 = scmp.lt.s32.totalorder %s116_s7, %s116_s7 }
  0x25   :  { %v35_v2 = vstv %s28_s4  ;;  %v49_v10 = vstv %s77_s5  ;;  %p123_p0 = por %p122_p13, %p121_p12 }
  0x26   :  { %v36_v3 = vsub.s32 %v31_v1, %v35_v2 }
  0x27   :  { %p124_p1 = pnand %p123_p0, %p117_p11 }
  0x28   :  { %v38_v4 = vsub.s32 0, %v36_v3  ;;  %vm37_vm0 = vcmp.lt.s32.totalorder %v36_v3, 0 }
  0x2a   :  { %v78_v5 = vmin.u32 %v38_v4, %v36_v3 }
  0x2c   :  { %v41_v6 = vand.u32 63, %v78_v5 }
  0x2e   :  { %v42_v7 = vsub.s32 0, %v41_v6 }
  0x30   :  { %v43_v8 = vsel %vm37_vm0, %v42_v7, %v41_v6 }
  0x31   :  { %vm44_vm1 = vcmp.ne.s32.totalorder %v43_v8, 0  ;;  %vm45_vm2 = vcmp.lt.s32.totalorder %v43_v8, 0  ;;  %v47_v9 = vadd.s32 64, %v43_v8 }
  0x32   :  { %vm46_vm3 = vmand %vm45_vm2, %vm44_vm1 }
  0x33   :  { %v48_v13 = vsel %vm46_vm3, %v47_v9, %v43_v8 }
  0x34   :  { %vm50_vm5 = vcmp.lt.s32.totalorder %v48_v13, %v49_v10 }
  0x35   :  { %v55_v14 = vsel %vm50_vm5, 0.0, %v51_v11  ;;  %v56_v15 = vsel %vm50_vm5, 0.0, %v52_v12 }
  0x36   :  { %58 = vst.msk [vmem:[#allocation7] sm:$0xff] %vm57_vm4, %v55_v14  ;;  %59 = vst.msk [vmem:[#allocation7 + $0x8] sm:$0xff] %vm57_vm4, %v56_v15 }
  0x37   :  { %127 = shalt.err (!%p124_p1)
}
  0x38   :  { %s128_s10 = scalar_lea.hbm %s208_s2, 256 }
  0x39   :  { %p129_p2 = scmp.ne.s32.totalorder %s208_s2, %s128_s10  ;;  %p132_p3 = scmp.lt.u32.totalorder %s128_s10, %s208_s2 }
  0x3b   :  { %p134_p4 = pnand %p132_p3, %p129_p2 }
  0x3d   :  { %137 = shalt.err (!%p134_p4)
}
  0x3e   :  { %71 = dma.vmem_to_hbm [thread:$0]  %s66_s1, 256, %s208_s2, [#allocation6], %s146_s28, %s146_s28, %s147_s29  }
  0x3f   :  { %142 = dma.done.wait [#allocation6], 256  }
  0x40   :  { %143 = vsyncadd [#allocation6], 4294967040 }
  0x41   :  { %75 = vsyncpa [#allocation5], 1 }
  0x42   :  { %76 = vsyncpa [#allocation6], 1 }

</bundles_post_ra>
